<compile_context>
chip_gen: v7x
topology: tpu7x:2x2x1
jax: 0.10.0
libtpu: 0.0.40
codegen_flags: <defaults>
</compile_context>

<pallas_src>
import functools
import math

import jax
import jax.numpy as jnp
import numpy as np
from jax import lax
from jax.experimental import pallas as pl
from jax.experimental.pallas import tpu as pltpu


# ------------------------------ small helpers --------------------------------

def _round_up(n, m):
    return ((n + m - 1) // m) * m


def _pick_tile(n, max_tile, align):
    """Tile size (multiple of `align`) <= max_tile; caller pads n up to a multiple."""
    if n <= max_tile:
        return _round_up(n, align)
    return (max_tile // align) * align


def _pad_to(x, axis, size):
    pad = size - x.shape[axis]
    if pad == 0:
        return x
    widths = [(0, 0)] * x.ndim
    widths[axis] = (0, pad)
    return jnp.pad(x, widths)


def _fixed_spec(arr):
    """BlockSpec for an array kept fully resident across the grid."""
    nd = arr.ndim
    return pl.BlockSpec(arr.shape, lambda *_: (0,) * nd)


@functools.lru_cache(maxsize=None)
def _vmem_limit():
    """Per-generation scoped-VMEM limit (~3/4 of physical), with safe fallback."""
    try:
        cap = int(pltpu.get_tpu_info().vmem_capacity_bytes)
        return max(32 * 1024 * 1024, (cap * 3) // 4)
    except Exception:
        return 32 * 1024 * 1024


# --------------------------- in-kernel math helpers ---------------------------

def _layernorm(x, scale, shift, eps=1e-5):
    mean = jnp.mean(x, axis=-1, keepdims=True)
    var = jnp.mean((x - mean) ** 2, axis=-1, keepdims=True)   # unbiased=False
    return scale * ((x - mean) / jnp.sqrt(var + eps)) + shift


def _gelu(x):
    c = math.sqrt(2.0 / math.pi)
    return 0.5 * x * (1.0 + jnp.tanh(c * (x + 0.044715 * x * x * x)))


# ------------------------------ attention kernel ------------------------------
# grid = (B, H); b "parallel", h "arbitrary" (reduction into the resident output).

@functools.lru_cache(maxsize=None)
def _attn_kernel(head_dim, compute_dtype):
    inv_sqrt_hd = 1.0 / math.sqrt(head_dim)

    def kernel(x_ref, ln1_s_ref, ln1_b_ref, wqkv_ref, wo_ref, bo_ref, out_ref):
        x = x_ref[0]                                        # (S, E), f32 residual input

        @pl.when(pl.program_id(1) == 0)
        def _init():
            out_ref[0] = x + bo_ref[...]                    # residual + out-proj bias, once

        hn = _layernorm(x, ln1_s_ref[...], ln1_b_ref[...]).astype(compute_dtype)
        qkv = jnp.dot(hn, wqkv_ref[0],
                      preferred_element_type=jnp.float32)   # (S, 3*hd), f32 accum
        q = (qkv[:, :head_dim] * inv_sqrt_hd).astype(compute_dtype)  # fold 1/sqrt(hd)
        k = qkv[:, head_dim:2 * head_dim].astype(compute_dtype)
        v = qkv[:, 2 * head_dim:].astype(compute_dtype)

        scores = lax.dot_general(q, k, (((1,), (1,)), ((), ())),
                                 preferred_element_type=jnp.float32)  # (S, S)
        S = scores.shape[0]
        row = lax.broadcasted_iota(jnp.int32, (S, S), 0)
        col = lax.broadcasted_iota(jnp.int32, (S, S), 1)
        scores = scores + jnp.where(col > row, jnp.float32(-1e30), jnp.float32(0.0))

        m = jnp.max(scores, axis=-1, keepdims=True)
        p = jnp.exp(scores - m)
        l = jnp.sum(p, axis=-1, keepdims=True)
        w = (p * (1.0 / l)).astype(compute_dtype)           # one reciprocal per row

        ctx = jnp.dot(w, v, preferred_element_type=jnp.float32)        # (S, hd)
        out_ref[0] += jnp.dot(ctx.astype(compute_dtype), wo_ref[0],
                              preferred_element_type=jnp.float32)       # (S, E)

    return kernel


def run_attention(x, ln1_s, ln1_b, wqkv, wo, bo):
    B, S, E = x.shape
    H, _, three_hd = wqkv.shape
    hd = three_hd // 3
    cd = wqkv.dtype
    wbytes = int((wqkv.size + wo.size) * jnp.dtype(cd).itemsize)

    cost = pl.CostEstimate(
        flops=int(2 * B * S * E * 3 * E + 4 * B * S * S * E + 2 * B * S * E * E),
        transcendentals=int(B * H * S * S),
        bytes_accessed=int(2 * B * S * E * 4 + wbytes))

    return pl.pallas_call(
        _attn_kernel(hd, cd),
        out_shape=jax.ShapeDtypeStruct((B, S, E), jnp.float32),
        grid=(B, H),
        in_specs=[
            pl.BlockSpec((1, S, E), lambda b, h: (b, 0, 0)),
            pl.BlockSpec((1, E), lambda b, h: (0, 0)),
            pl.BlockSpec((1, E), lambda b, h: (0, 0)),
            pl.BlockSpec((1, E, three_hd), lambda b, h: (h, 0, 0)),   # per-head QKV slice
            pl.BlockSpec((1, hd, E), lambda b, h: (h, 0, 0)),         # per-head out-proj slice
            pl.BlockSpec((1, E), lambda b, h: (0, 0)),
        ],
        out_specs=pl.BlockSpec((1, S, E), lambda b, h: (b, 0, 0)),    # resident across h
        compiler_params=pltpu.CompilerParams(
            dimension_semantics=("parallel", "arbitrary"),
            vmem_limit_bytes=_vmem_limit()),
        cost_estimate=cost,
    )(x, ln1_s, ln1_b, wqkv, wo, bo)


# --------------------------------- FFN kernel ---------------------------------
# grid over row tiles of the flattened (B*S, E) activations; weights resident.

@functools.lru_cache(maxsize=None)
def _ffn_kernel(compute_dtype):
    def kernel(x_ref, ln2_s_ref, ln2_b_ref, w1_ref, b1_ref, w2_ref, b2_ref, out_ref):
        x = x_ref[...]                                              # (tm, E), f32
        h = _layernorm(x, ln2_s_ref[...], ln2_b_ref[...]).astype(compute_dtype)
        ff = jnp.dot(h, w1_ref[...], preferred_element_type=jnp.float32) + b1_ref[...]
        ff = _gelu(ff).astype(compute_dtype)
        ff = jnp.dot(ff, w2_ref[...], preferred_element_type=jnp.float32) + b2_ref[...]
        out_ref[...] = x + ff                                       # residual
    return kernel


def run_ffn(x, ln2_s, ln2_b, w1, b1, w2, b2, *, row_tile=256):
    B, S, E = x.shape
    Eh = w1.shape[1]
    cd = w1.dtype
    M = B * S
    tm = _pick_tile(M, row_tile, 8)
    Mp = _round_up(M, tm)
    x2 = _pad_to(x.reshape(M, E), 0, Mp)

    cost = pl.CostEstimate(
        flops=int(4 * M * E * Eh),
        transcendentals=int(M * Eh),
        bytes_accessed=int(2 * M * E * 4
                           + (w1.size + w2.size) * jnp.dtype(cd).itemsize))

    out = pl.pallas_call(
        _ffn_kernel(cd),
        out_shape=jax.ShapeDtypeStruct((Mp, E), jnp.float32),
        grid=(Mp // tm,),
        in_specs=[pl.BlockSpec((tm, E), lambda i: (i, 0)),
                  _fixed_spec(ln2_s), _fixed_spec(ln2_b),
                  _fixed_spec(w1), _fixed_spec(b1),
                  _fixed_spec(w2), _fixed_spec(b2)],
        out_specs=pl.BlockSpec((tm, E), lambda i: (i, 0)),
        compiler_params=pltpu.CompilerParams(
            dimension_semantics=("parallel",),
            vmem_limit_bytes=_vmem_limit()),
        cost_estimate=cost,
    )(x2, ln2_s, ln2_b, w1, b1, w2, b2)
    return out[:M].reshape(B, S, E)


# ----------------------- final LayerNorm + LM head kernels --------------------

@functools.lru_cache(maxsize=None)
def _lnf_kernel(out_dtype):
    def kernel(x_ref, s_ref, b_ref, o_ref):
        o_ref[...] = _layernorm(x_ref[...], s_ref[...], b_ref[...]).astype(out_dtype)
    return kernel


def _lm_head_kernel(x_ref, w_ref, out_ref):
    out_ref[...] = jnp.dot(x_ref[...], w_ref[...], preferred_element_type=jnp.float32)


def run_lm_head(x, lnf_s, lnf_b, w_out, *, row_tile=512, vocab_tile=4096):
    B, S, E = x.shape
    V = w_out.shape[1]
    cd = w_out.dtype
    M = B * S

    tm = _pick_tile(M, row_tile, 8)
    tv = _pick_tile(V, vocab_tile, 128)
    Mp = _round_up(M, tm)
    Vp = _round_up(V, tv)

    x2 = _pad_to(x.reshape(M, E), 0, Mp)
    w_out_p = _pad_to(w_out, 1, Vp)

    # Final LayerNorm hoisted into a tiny row-tiled pre-pass (emits compute dtype).
    xn = pl.pallas_call(
        _lnf_kernel(cd),
        out_shape=jax.ShapeDtypeStruct((Mp, E), cd),
        grid=(Mp // tm,),
        in_specs=[pl.BlockSpec((tm, E), lambda i: (i, 0)),
                  pl.BlockSpec((1, E), lambda i: (0, 0)),
                  pl.BlockSpec((1, E), lambda i: (0, 0))],
        out_specs=pl.BlockSpec((tm, E), lambda i: (i, 0)),
        compiler_params=pltpu.CompilerParams(
            dimension_semantics=("parallel",),
            vmem_limit_bytes=_vmem_limit()),
    )(x2, lnf_s, lnf_b)

    # LM head: vocab tiles OUTER, row tiles INNER -> each (E, tv) W_out tile is
    # DMA'd exactly once; the small x operand is the one that gets re-streamed.
    itemsize = jnp.dtype(cd).itemsize
    cost = pl.CostEstimate(
        flops=int(2 * M * E * V),
        transcendentals=0,
        bytes_accessed=int(E * Vp * itemsize
                           + Mp * E * itemsize * (Vp // tv)
                           + Mp * Vp * 4))

    logits = pl.pallas_call(
        _lm_head_kernel,
        out_shape=jax.ShapeDtypeStruct((Mp, Vp), jnp.float32),
        grid=(Vp // tv, Mp // tm),
        in_specs=[pl.BlockSpec((tm, E), lambda j, i: (i, 0)),
                  pl.BlockSpec((E, tv), lambda j, i: (0, j))],   # constant across inner i
        out_specs=pl.BlockSpec((tm, tv), lambda j, i: (i, j)),
        compiler_params=pltpu.CompilerParams(
            dimension_semantics=("parallel", "parallel"),
            vmem_limit_bytes=_vmem_limit()),
        cost_estimate=cost,
    )(xn, w_out_p)

    return logits[:M, :V].reshape(B, S, V)


# ------------------------------- parameter init -------------------------------

def init_params(key, cfg):
    E = cfg['emb_dim']
    V = cfg['vocab_size']
    C = cfg['context_length']
    params = {}
    key, k1, k2, k3 = jax.random.split(key, 4)
    params['tok_emb'] = 0.02 * jax.random.normal(k1, (V, E), jnp.float32)
    params['pos_emb'] = 0.02 * jax.random.normal(k2, (C, E), jnp.float32)
    params['out_head'] = 0.02 * jax.random.normal(k3, (E, V), jnp.float32)   # (in, out)
    params['lnf_s'] = jnp.ones((1, E), jnp.float32)
    params['lnf_b'] = jnp.zeros((1, E), jnp.float32)

    blocks = []
    for _ in range(cfg['n_layers']):
        key, kq, kk, kv, ko, k1w, k2w = jax.random.split(key, 7)
        blocks.append(dict(
            ln1_s=jnp.ones((1, E), jnp.float32),
            ln1_b=jnp.zeros((1, E), jnp.float32),
            wq=0.02 * jax.random.normal(kq, (E, E), jnp.float32),
            wk=0.02 * jax.random.normal(kk, (E, E), jnp.float32),
            wv=0.02 * jax.random.normal(kv, (E, E), jnp.float32),
            wo=0.02 * jax.random.normal(ko, (E, E), jnp.float32),
            bo=jnp.zeros((1, E), jnp.float32),
            ln2_s=jnp.ones((1, E), jnp.float32),
            ln2_b=jnp.zeros((1, E), jnp.float32),
            w1=0.02 * jax.random.normal(k1w, (E, 4 * E), jnp.float32),
            b1=jnp.zeros((1, 4 * E), jnp.float32),
            w2=0.02 * jax.random.normal(k2w, (4 * E, E), jnp.float32),
            b2=jnp.zeros((1, E), jnp.float32),
        ))
    params['blocks'] = blocks
    return params


def prepare_params(params, cfg, compute_dtype=jnp.bfloat16):
    """Pre-fuse per-head QKV / out-proj weights (once) and cast weights to compute dtype."""
    E = cfg['emb_dim']
    H = cfg['n_heads']
    hd = E // H

    def to_heads(w):                       # (E, E) -> (H, E, hd)
        return w.reshape(E, H, hd).transpose(1, 0, 2)

    prepared = {
        'tok_emb': params['tok_emb'],
        'pos_emb': params['pos_emb'],
        'lnf_s': params['lnf_s'],
        'lnf_b': params['lnf_b'],
        'out_head': params['out_head'].astype(compute_dtype),
    }
    blocks = []
    for blk in params['blocks']:
        wqkv = jnp.concatenate([to_heads(blk['wq']),
                                to_heads(blk['wk']),
                                to_heads(blk['wv'])], axis=-1)       # (H, E, 3*hd)
        blocks.append(dict(
            ln1_s=blk['ln1_s'], ln1_b=blk['ln1_b'],
            wqkv=wqkv.astype(compute_dtype),
            wo=blk['wo'].reshape(H, hd, E).astype(compute_dtype),    # (H, hd, E)
            bo=blk['bo'],
            ln2_s=blk['ln2_s'], ln2_b=blk['ln2_b'],
            w1=blk['w1'].astype(compute_dtype), b1=blk['b1'],
            w2=blk['w2'].astype(compute_dtype), b2=blk['b2'],
        ))
    prepared['blocks'] = blocks
    return prepared


# ------------------------------- model forward --------------------------------

def gpt_forward(prepared, in_idx, *, ffn_row_tile=256, lm_row_tile=512, vocab_tile=4096):
    B, S = in_idx.shape
    # embedding gather (glue, plain JAX)
    tok = jnp.take(prepared['tok_emb'], in_idx, axis=0)        # (B, S, E)
    x = tok + prepared['pos_emb'][:S][None, :, :]
    # TODO(synk): nn.Dropout layers treated as identity (drop_rate = 0.0 / eval mode).
    for blk in prepared['blocks']:
        x = run_attention(x, blk['ln1_s'], blk['ln1_b'],
                          blk['wqkv'], blk['wo'], blk['bo'])
        x = run_ffn(x, blk['ln2_s'], blk['ln2_b'],
                    blk['w1'], blk['b1'], blk['w2'], blk['b2'],
                    row_tile=ffn_row_tile)
    # TODO(synk): cross-call weight prefetch (P10) for the next layer not applied.
    return run_lm_head(x, prepared['lnf_s'], prepared['lnf_b'], prepared['out_head'],
                       row_tile=lm_row_tile, vocab_tile=vocab_tile)


# --------------------------- pure-JAX reference (check) -----------------------

def reference_forward(params, in_idx, cfg):
    B, S = in_idx.shape
    E = cfg['emb_dim']
    H = cfg['n_heads']
    hd = E // H
    x = jnp.take(params['tok_emb'], in_idx, axis=0) + params['pos_emb'][:S][None]

    def ln(v, s, b):
        m = v.mean(-1, keepdims=True)
        var = ((v - m) ** 2).mean(-1, keepdims=True)
        return s * (v - m) / jnp.sqrt(var + 1e-5) + b

    def gelu(v):
        c = math.sqrt(2.0 / math.pi)
        return 0.5 * v * (1 + jnp.tanh(c * (v + 0.044715 * v ** 3)))

    mask = jnp.triu(jnp.ones((S, S), bool), k=1)
    for blk in params['blocks']:
        h = ln(x, blk['ln1_s'], blk['ln1_b'])
        q = (h @ blk['wq']).reshape(B, S, H, hd).transpose(0, 2, 1, 3)
        k = (h @ blk['wk']).reshape(B, S, H, hd).transpose(0, 2, 1, 3)
        v = (h @ blk['wv']).reshape(B, S, H, hd).transpose(0, 2, 1, 3)
        sc = jnp.einsum('bhqd,bhkd->bhqk', q, k)
        sc = jnp.where(mask[None, None], -jnp.inf, sc) / math.sqrt(hd)
        watt = jax.nn.softmax(sc, axis=-1)
        ctx = jnp.einsum('bhqk,bhkd->bhqd', watt, v).transpose(0, 2, 1, 3).reshape(B, S, E)
        x = x + (ctx @ blk['wo'] + blk['bo'])
        h2 = ln(x, blk['ln2_s'], blk['ln2_b'])
        x = x + (gelu(h2 @ blk['w1'] + blk['b1']) @ blk['w2'] + blk['b2'])
    x = ln(x, params['lnf_s'], params['lnf_b'])
    return x @ params['out_head']


# ------------------------------------ main ------------------------------------

if __name__ == "__main__":
    cfg = {
        'vocab_size': 512,
        'context_length': 32,
        'emb_dim': 128,      # lane-aligned
        'n_heads': 4,
        'n_layers': 2,
        'drop_rate': 0.0,
        'qkv_bias': False,
    }
    B, S = 2, 16

    key = jax.random.PRNGKey(0)
    kp, kd = jax.random.split(key)
    params = init_params(kp, cfg)
    in_idx = jax.random.randint(kd, (B, S), 0, cfg['vocab_size'], dtype=jnp.int32)

    ref = jax.block_until_ready(reference_forward(params, in_idx, cfg))

    # Small tiles so the row/vocab grids are actually exercised at toy sizes;
    # production defaults are ffn_row_tile=256, lm_row_tile=512, vocab_tile=4096.

    # 1) exact-parity path (f32 compute) against the pure-JAX reference
    prep_f32 = prepare_params(params, cfg, compute_dtype=jnp.float32)
    logits_f32 = jax.block_until_ready(
        gpt_forward(prep_f32, in_idx, ffn_row_tile=16, lm_row_tile=16, vocab_tile=128))
    np.testing.assert_allclose(np.asarray(logits_f32), np.asarray(ref),
                               rtol=2e-3, atol=2e-3)

    # 2) default fast path (bf16 matmul inputs, f32 accumulation)
    prep_bf16 = prepare_params(params, cfg, compute_dtype=jnp.bfloat16)
    logits = jax.block_until_ready(
        gpt_forward(prep_bf16, in_idx, ffn_row_tile=16, lm_row_tile=16, vocab_tile=128))
    np.testing.assert_allclose(np.asarray(logits), np.asarray(ref),
                               rtol=5e-2, atol=5e-2)

    assert logits.shape == (B, S, cfg['vocab_size'])
    print("KERNEL_OK")
</pallas_src>

<mosaic_0001>
module attributes {stable_mosaic.version = 11 : i64} {
  func.func @kernel(%arg0: i32, %arg1: i32, %arg2: memref<1x16x128xf32, #tpu.memory_space<vmem>>, %arg3: memref<1x128xf32, #tpu.memory_space<vmem>>, %arg4: memref<1x128xf32, #tpu.memory_space<vmem>>, %arg5: memref<1x128x96xf32, #tpu.memory_space<vmem>>, %arg6: memref<1x32x128xf32, #tpu.memory_space<vmem>>, %arg7: memref<1x128xf32, #tpu.memory_space<vmem>>, %arg8: memref<1x16x128xf32, #tpu.memory_space<vmem>>) attributes {dimension_semantics = [#tpu.dimension_semantics<parallel>, #tpu.dimension_semantics<arbitrary>], iteration_bounds = array<i64: 2, 4>, scalar_prefetch = 0 : i64, scratch_operands = 0 : i64, tpu.core_type = #tpu.core_type<tc>, window_params = [{transform_indices = @transform_0, window_bounds = array<i64: 1, 16, 128>}, {pipeline_mode = #tpu.pipeline_mode<synchronous>, transform_indices = @transform_1, window_bounds = array<i64: 1, 128>}, {pipeline_mode = #tpu.pipeline_mode<synchronous>, transform_indices = @transform_2, window_bounds = array<i64: 1, 128>}, {transform_indices = @transform_3, window_bounds = array<i64: 1, 128, 96>}, {transform_indices = @transform_4, window_bounds = array<i64: 1, 32, 128>}, {pipeline_mode = #tpu.pipeline_mode<synchronous>, transform_indices = @transform_5, window_bounds = array<i64: 1, 128>}, {transform_indices = @transform_6, window_bounds = array<i64: 1, 16, 128>}]} {
    %c0 = arith.constant 0 : index
    %c0_0 = arith.constant 0 : index
    %c0_1 = arith.constant 0 : index
    %0 = vector.load %arg2[%c0, %c0_0, %c0_1] : memref<1x16x128xf32, #tpu.memory_space<vmem>>, vector<1x16x128xf32>
    %1 = vector.shape_cast %0 : vector<1x16x128xf32> to vector<16x128xf32>
    %c0_i32 = arith.constant 0 : i32
    %2 = arith.cmpi eq, %arg1, %c0_i32 : i32
    %3 = arith.extui %2 : i1 to i32
    %c0_i32_2 = arith.constant 0 : i32
    %4 = arith.cmpi ne, %3, %c0_i32_2 : i32
    scf.if %4 {
      %c0_33 = arith.constant 0 : index
      %c0_34 = arith.constant 0 : index
      %66 = vector.load %arg7[%c0_33, %c0_34] : memref<1x128xf32, #tpu.memory_space<vmem>>, vector<1x128xf32>
      %67 = vector.broadcast %66 : vector<1x128xf32> to vector<16x128xf32>
      %68 = arith.addf %1, %67 : vector<16x128xf32>
      %c0_35 = arith.constant 0 : index
      %c0_36 = arith.constant 0 : index
      %c0_37 = arith.constant 0 : index
      %69 = vector.load %arg8[%c0_35, %c0_36, %c0_37] : memref<1x16x128xf32, #tpu.memory_space<vmem>>, vector<1x16x128xf32>
      %70 = vector.shape_cast %69 : vector<1x16x128xf32> to vector<16x128xf32>
      %71 = vector.shape_cast %68 : vector<16x128xf32> to vector<1x16x128xf32>
      tpu.vector_store %arg8[%c0_35, %c0_36, %c0_37], %71 {strides = array<i32>} : memref<1x16x128xf32, #tpu.memory_space<vmem>>, vector<1x16x128xf32>,
    } else {
    }
    %c0_3 = arith.constant 0 : index
    %c0_4 = arith.constant 0 : index
    %5 = vector.load %arg3[%c0_3, %c0_4] : memref<1x128xf32, #tpu.memory_space<vmem>>, vector<1x128xf32>
    %c0_5 = arith.constant 0 : index
    %c0_6 = arith.constant 0 : index
    %6 = vector.load %arg4[%c0_5, %c0_6] : memref<1x128xf32, #tpu.memory_space<vmem>>, vector<1x128xf32>
    %cst = arith.constant dense<0.000000e+00> : vector<16xf32>
    %7 = vector.multi_reduction <add>, %1, %cst [1] : vector<16x128xf32> to vector<16xf32>
    %8 = vector.shape_cast %7 : vector<16xf32> to vector<16x1xf32>
    %cst_7 = arith.constant 1.280000e+02 : f32
    %9 = vector.broadcast %cst_7 : f32 to vector<16x1xf32>
    %10 = arith.divf %8, %9 : vector<16x1xf32>
    %11 = vector.broadcast %10 : vector<16x1xf32> to vector<16x128xf32>
    %12 = arith.subf %1, %11 : vector<16x128xf32>
    %13 = arith.mulf %12, %12 : vector<16x128xf32>
    %cst_8 = arith.constant dense<0.000000e+00> : vector<16xf32>
    %14 = vector.multi_reduction <add>, %13, %cst_8 [1] : vector<16x128xf32> to vector<16xf32>
    %15 = vector.shape_cast %14 : vector<16xf32> to vector<16x1xf32>
    %cst_9 = arith.constant 1.280000e+02 : f32
    %16 = vector.broadcast %cst_9 : f32 to vector<16x1xf32>
    %17 = arith.divf %15, %16 : vector<16x1xf32>
    %18 = vector.broadcast %10 : vector<16x1xf32> to vector<16x128xf32>
    %19 = arith.subf %1, %18 : vector<16x128xf32>
    %cst_10 = arith.constant 9.99999974E-6 : f32
    %20 = vector.broadcast %cst_10 : f32 to vector<16x1xf32>
    %21 = arith.addf %17, %20 : vector<16x1xf32>
    %22 = math.sqrt %21 : vector<16x1xf32>
    %23 = vector.broadcast %22 : vector<16x1xf32> to vector<16x128xf32>
    %24 = arith.divf %19, %23 : vector<16x128xf32>
    %25 = vector.broadcast %5 : vector<1x128xf32> to vector<16x128xf32>
    %26 = arith.mulf %25, %24 : vector<16x128xf32>
    %27 = vector.broadcast %6 : vector<1x128xf32> to vector<16x128xf32>
    %28 = arith.addf %26, %27 : vector<16x128xf32>
    %c0_11 = arith.constant 0 : index
    %c0_12 = arith.constant 0 : index
    %c0_13 = arith.constant 0 : index
    %29 = vector.load %arg5[%c0_11, %c0_12, %c0_13] : memref<1x128x96xf32, #tpu.memory_space<vmem>>, vector<1x128x96xf32>
    %30 = vector.shape_cast %29 : vector<1x128x96xf32> to vector<128x96xf32>
    %cst_14 = arith.constant dense<0.000000e+00> : vector<16x96xf32>
    %31 = tpu.matmul %28, %30, %cst_14 {dimension_numbers = #tpu.dot_dimension_numbers<[1], [0], [0], [1], [0, 0, 1, 1], [], []>} : vector<16x128xf32>, vector<128x96xf32>, vector<16x96xf32> -> vector<16x96xf32>
    %32 = vector.extract_strided_slice %31 {offsets = [0, 0], sizes = [16, 32], strides = [1, 1]} : vector<16x96xf32> to vector<16x32xf32>
    %cst_15 = arith.constant 0.176776692 : f32
    %33 = vector.broadcast %cst_15 : f32 to vector<16x32xf32>
    %34 = arith.mulf %32, %33 : vector<16x32xf32>
    %35 = vector.extract_strided_slice %31 {offsets = [0, 32], sizes = [16, 32], strides = [1, 1]} : vector<16x96xf32> to vector<16x32xf32>
    %36 = vector.extract_strided_slice %31 {offsets = [0, 64], sizes = [16, 32], strides = [1, 1]} : vector<16x96xf32> to vector<16x32xf32>
    %cst_16 = arith.constant dense<0.000000e+00> : vector<16x16xf32>
    %37 = tpu.matmul %34, %35, %cst_16 {dimension_numbers = #tpu.dot_dimension_numbers<[1], [1], [0], [0], [0, 0, 1, 0], [], []>} : vector<16x32xf32>, vector<16x32xf32>, vector<16x16xf32> -> vector<16x16xf32>
    %38 = tpu.iota {dimensions = array<i32: 0>} : vector<16x16xi32>
    %39 = tpu.iota {dimensions = array<i32: 1>} : vector<16x16xi32>
    %40 = arith.cmpi sgt, %39, %38 : vector<16x16xi32>
    %cst_17 = arith.constant -1.000000e+30 : f32
    %cst_18 = arith.constant 0.000000e+00 : f32
    %41 = vector.broadcast %cst_17 : f32 to vector<16x16xf32>
    %42 = vector.broadcast %cst_18 : f32 to vector<16x16xf32>
    %43 = arith.select %40, %41, %42 : vector<16x16xi1>, vector<16x16xf32>
    %44 = arith.addf %37, %43 : vector<16x16xf32>
    %cst_19 = arith.constant dense<0xFF800000> : vector<16xf32>
    %45 = vector.multi_reduction <maximumf>, %44, %cst_19 [1] : vector<16x16xf32> to vector<16xf32>
    %46 = vector.shape_cast %45 : vector<16xf32> to vector<16x1xf32>
    %47 = vector.broadcast %46 : vector<16x1xf32> to vector<16x16xf32>
    %48 = arith.subf %44, %47 : vector<16x16xf32>
    %49 = math.exp %48 : vector<16x16xf32>
    %cst_20 = arith.constant dense<0.000000e+00> : vector<16xf32>
    %50 = vector.multi_reduction <add>, %49, %cst_20 [1] : vector<16x16xf32> to vector<16xf32>
    %51 = vector.shape_cast %50 : vector<16xf32> to vector<16x1xf32>
    %cst_21 = arith.constant 1.000000e+00 : f32
    %52 = vector.broadcast %cst_21 : f32 to vector<16x1xf32>
    %53 = arith.divf %52, %51 : vector<16x1xf32>
    %54 = vector.broadcast %53 : vector<16x1xf32> to vector<16x16xf32>
    %55 = arith.mulf %49, %54 : vector<16x16xf32>
    %cst_22 = arith.constant dense<0.000000e+00> : vector<16x32xf32>
    %56 = tpu.matmul %55, %36, %cst_22 {dimension_numbers = #tpu.dot_dimension_numbers<[1], [0], [0], [1], [0, 0, 1, 1], [], []>} : vector<16x16xf32>, vector<16x32xf32>, vector<16x32xf32> -> vector<16x32xf32>
    %c0_23 = arith.constant 0 : index
    %c0_24 = arith.constant 0 : index
    %c0_25 = arith.constant 0 : index
    %57 = vector.load %arg8[%c0_23, %c0_24, %c0_25] : memref<1x16x128xf32, #tpu.memory_space<vmem>>, vector<1x16x128xf32>
    %58 = vector.shape_cast %57 : vector<1x16x128xf32> to vector<16x128xf32>
    %c0_26 = arith.constant 0 : index
    %c0_27 = arith.constant 0 : index
    %c0_28 = arith.constant 0 : index
    %59 = vector.load %arg6[%c0_26, %c0_27, %c0_28] : memref<1x32x128xf32, #tpu.memory_space<vmem>>, vector<1x32x128xf32>
    %60 = vector.shape_cast %59 : vector<1x32x128xf32> to vector<32x128xf32>
    %cst_29 = arith.constant dense<0.000000e+00> : vector<16x128xf32>
    %61 = tpu.matmul %56, %60, %cst_29 {dimension_numbers = #tpu.dot_dimension_numbers<[1], [0], [0], [1], [0, 0, 1, 1], [], []>} : vector<16x32xf32>, vector<32x128xf32>, vector<16x128xf32> -> vector<16x128xf32>
    %62 = arith.addf %58, %61 : vector<16x128xf32>
    %c0_30 = arith.constant 0 : index
    %c0_31 = arith.constant 0 : index
    %c0_32 = arith.constant 0 : index
    %63 = vector.load %arg8[%c0_30, %c0_31, %c0_32] : memref<1x16x128xf32, #tpu.memory_space<vmem>>, vector<1x16x128xf32>
    %64 = vector.shape_cast %63 : vector<1x16x128xf32> to vector<16x128xf32>
    %65 = vector.shape_cast %62 : vector<16x128xf32> to vector<1x16x128xf32>
    tpu.vector_store %arg8[%c0_30, %c0_31, %c0_32], %65 {strides = array<i32>} : memref<1x16x128xf32, #tpu.memory_space<vmem>>, vector<1x16x128xf32>,
    return
  }
  func.func @transform_0(%arg0: i32, %arg1: i32) -> (i32, i32, i32) {
    %c0_i32 = arith.constant 0 : i32
    %c0_i32_0 = arith.constant 0 : i32
    %c0_i32_1 = arith.constant 0 : i32
    return %arg0, %c0_i32, %c0_i32_0 : i32, i32, i32
  }
  func.func @transform_1(%arg0: i32, %arg1: i32) -> (i32, i32) {
    %c0_i32 = arith.constant 0 : i32
    %c0_i32_0 = arith.constant 0 : i32
    %c0_i32_1 = arith.constant 0 : i32
    return %c0_i32, %c0_i32_0 : i32, i32
  }
  func.func @transform_2(%arg0: i32, %arg1: i32) -> (i32, i32) {
    %c0_i32 = arith.constant 0 : i32
    %c0_i32_0 = arith.constant 0 : i32
    %c0_i32_1 = arith.constant 0 : i32
    return %c0_i32, %c0_i32_0 : i32, i32
  }
  func.func @transform_3(%arg0: i32, %arg1: i32) -> (i32, i32, i32) {
    %c0_i32 = arith.constant 0 : i32
    %c0_i32_0 = arith.constant 0 : i32
    %c0_i32_1 = arith.constant 0 : i32
    return %arg1, %c0_i32, %c0_i32_0 : i32, i32, i32
  }
  func.func @transform_4(%arg0: i32, %arg1: i32) -> (i32, i32, i32) {
    %c0_i32 = arith.constant 0 : i32
    %c0_i32_0 = arith.constant 0 : i32
    %c0_i32_1 = arith.constant 0 : i32
    return %arg1, %c0_i32, %c0_i32_0 : i32, i32, i32
  }
  func.func @transform_5(%arg0: i32, %arg1: i32) -> (i32, i32) {
    %c0_i32 = arith.constant 0 : i32
    %c0_i32_0 = arith.constant 0 : i32
    %c0_i32_1 = arith.constant 0 : i32
    return %c0_i32, %c0_i32_0 : i32, i32
  }
  func.func @transform_6(%arg0: i32, %arg1: i32) -> (i32, i32, i32) {
    %c0_i32 = arith.constant 0 : i32
    %c0_i32_0 = arith.constant 0 : i32
    %c0_i32_1 = arith.constant 0 : i32
    return %arg0, %c0_i32, %c0_i32_0 : i32, i32, i32
  }
}

</mosaic_0001>

<bundles_post_ra>
// kernel: tpu_custom_call.1
= control target key start
LH: loop header
LB: loop body
LE: loop exit
PB: predicated region body
PF: predicated region fallthrough
CT: control target
= control target key end

     0   :  { %11 = vsyncpa [#allocation3], 0  ;;  %s1508_s0 = inlined_call_operand.vmem [shape: f32[2,16,128], index: 0, kind: input, shape index: {}]   ;;  %s1509_s1 = inlined_call_operand.vmem [shape: f32[1,128], index: 1, kind: input, shape index: {}]   ;;  %s1510_s2 = inlined_call_operand.vmem [shape: f32[1,128], index: 2, kind: input, shape index: {}]   ;;  %s1511_s3 = inlined_call_operand.vmem [shape: f32[4,128,96], index: 3, kind: input, shape index: {}]   ;;  %s1512_s4 = inlined_call_operand.vmem [shape: f32[4,32,128], index: 4, kind: input, shape index: {}]   ;;  %s1513_s5 = inlined_call_operand.vmem [shape: f32[1,128], index: 5, kind: input, shape index: {}]   ;;  %s1514_s6 = inlined_call_operand.hbm [shape: f32[2,16,128], index: 6, kind: output, shape index: {}]  }
   0x1   :  { %13 = vsyncpa [#allocation3 + $0x1], 0  ;;  %s1296_s21 = smov 0   ;;  %s1298_s22 = smov 0  }
   0x2   :  { %s1300_s23 = smov 0   ;;  %s1302_s24 = smov 0  }
   0x3   :  { %s1304_s25 = smov 0   ;;  %s1306_s26 = smov 0  }
   0x4   :  { %s1308_s27 = smov 0   ;;  %s1310_s28 = smov 0  }
   0x5 LB: > { %1519 = sst [smem:[#allocation5_spill]] %s1245_s26  ;;  %s882_s29 = sadd.s32 4294967295, %s1253_s28   ;;  %s1253_s28 = sphi %s1310_s28, %s19_s28   ;;  %s1249_s27 = sphi %s1308_s27, %s1531_s27   ;;  %s1245_s26 = sphi %s1306_s26, %s1530_s26   ;;  %s1241_s25 = sphi %s1304_s25, %s1529_s25   ;;  %s1237_s24 = sphi %s1302_s24, %s1528_s24   ;;  %s1233_s23 = sphi %s1300_s23, %s1534_s23   ;;  %s1229_s22 = sphi %s1298_s22, %s1533_s22   ;;  %s1225_s21 = sphi %s1296_s21, %s1532_s21  }
   0x6   : > { %1520 = sst [smem:[#allocation6_spill]] %s1249_s27  ;;  %s883_s30 = sadd.s32 4294967294, %s1253_s28  }
   0x7   : > { %s28_s7 = sadd.s32 1, %s1245_s26  ;;  %s31_s8 = sadd.s32 1, %s1249_s27 }
   0x8   : > { %p29_p0 = scmp.ge.s32.totalorder %s28_s7, 4  ;;  %p189_p1 = scmp.ne.s32.totalorder %s1233_s23, %s1229_s22 }
   0x9   : > { %p190_p2 = scmp.eq.s32.totalorder %s882_s29, 7  ;;  %p195_p4 = scmp.ne.s32.totalorder %s1229_s22, %s1225_s21 }
   0xa   : > { %s1536_s7 = smov (%p29_p0, %s28_s7), 0  ;;  %s1538_s8 = smov (!%p29_p0, %s31_s8), %s1249_s27 }
   0xb   : > { %1521 = sst [smem:[#allocation7_spill]] %s1536_s7  ;;  %p1345_p3 = por %p190_p2, %p189_p1 }
   0xc   : > { %p33_p5 = scmp.ge.s32.totalorder %s1538_s8, 2  ;;  %p196_p6 = scmp.eq.s32.totalorder %s883_s30, 7 }
   0xd   : > { %p886_p7 = scmp.ge.s32.totalorder %s1253_s28, 1  ;;  %p247_p8 = scmp.lt.s32.totalorder %s1253_s28, 9 }
   0xe   : > { %s1540_s8 = smov (%p33_p5, %s1538_s8), 0  ;;  %p1355_p9 = por %p196_p6, %p195_p4 }
   0xf   : > { %1523 = sst [smem:[#allocation8_spill]] %s1540_s8  ;;  %p248_p10 = pnand %p886_p7, %p247_p8 }
  0x10   : > { %s176_s11 = ssub.s32 %s1249_s27, %s1540_s8  ;;  %s179_s12 = sadd.s32 1, %s1233_s23 }
  0x11   : > { %p177_p11 = scmp.eq.s32.totalorder %s176_s11, 0  ;;  %251 = sbr.rel (%p248_p10) target bundleno = 1687 (0x697), region = 44 }
  0x12   : > { %s1518_s14 = sand.u32 (!%p248_p10), 1, %s1229_s22   ;;  %p287_p12 = scmp.lt.s32.totalorder (!%p248_p10), %s1241_s25, 1 }
  0x13   : > { %s1363_s13 = scalar_select %p177_p11, %s1233_s23, %s179_s12  }
  0x14   : > { %s887_s15 = sshll.u32 (!%p248_p10), %s1518_s14, 4  ;;  %p292_p13 = scmp.lt.s32.totalorder (!%p248_p10), %s1237_s24, 3 }
  0x15   : > { %1525 = sst [smem:[#allocation9_spill]] %s1363_s13  ;;  %s1385_s13 = scalar_lea.vmem (!%p248_p10), [#allocation2], %s887_s15 }
  0x16   : > { %p894_p0 = scmp.ne.s32.totalorder (!%p248_p10), %s1237_s24, 0 }
  0x18   : > { %s288_s16 = scalar_select %p287_p12, %s1241_s25, 1 }
  0x19   : > { %s293_s17 = scalar_select %p292_p13, %s1237_s24, 3 }
  0x1a   : > { %s911_s18 = sshll.u32 %s288_s16, 4  ;;  %307 = sbr.rel (%p894_p0) target bundleno = 33 (0x21), region = 48  ;;  %v895_v2 = vld [vmem:[%s1513_s5] ss:$0 sm:$0xff] (!%p894_p0) }
  0x1b   : > { %s291_s29 = scalar_lea.vmem %s1508_s0, %s911_s18  ;;  %s912_s30 = sshll.u32 %s293_s17, 7 }
  0x1c   : > { %s1378_s8 = scalar_lea.vmem %s1511_s3, %s912_s30  ;;  %s913_s7 = sshll.u32 %s293_s17, 5  ;;  %v302_v0 = vld [vmem:[%s291_s29] sm:$0xff]  ;;  %v303_v1 = vld [vmem:[%s291_s29 + $0x8] sm:$0xff] }
  0x1d   : > { %s1383_s14 = scalar_lea.vmem %s1512_s4, %s913_s7  ;;  %v315_v3 = vadd.f32 (!%p894_p0), %v895_v2, %v302_v0  ;;  %v316_v4 = vadd.f32 (!%p894_p0), %v895_v2, %v303_v1 }
  0x1f   : > { %317 = vst [vmem:[%s1385_s13] sm:$0xff] (!%p894_p0), %v315_v3  ;;  %318 = vst [vmem:[%s1385_s13 + $0x8] sm:$0xff] (!%p894_p0), %v316_v4 }
  0x21 PF: > { %321 = vadd.xlane.f32.xlu0 %v302_v0  ;;  %v374_v13 = vld [vmem:[%s1378_s8] sm:$0xff]  ;;  %v375_v14 = vld [vmem:[%s1378_s8 + $0x8] sm:$0xff]  ;;  %v376_v16 = vld [vmem:[%s1378_s8 + $0x10] sm:$0xff]  ;;  %vm482_vm4 = vcmask 261120   ;;  %vm568_vm8 = vcmask 130048   ;;  %s1257_s15 = smov 64  }
  0x22   : > { %v1007_v15 = vpack.c.bf16 %v375_v14, %v374_v13  ;;  %v377_v17 = vld [vmem:[%s1378_s8 + $0x18] sm:$0xff]  ;;  %v378_v19 = vld [vmem:[%s1378_s8 + $0x20] sm:$0xff]  ;;  %v379_v20 = vld [vmem:[%s1378_s8 + $0x28] sm:$0xff]  ;;  %s785_s17 = sshll.u32 %s1385_s13, 4  ;;  %s1526_s30 = sand.u32 1, %s1229_s22   ;;  %s1450_s17 = int_to_ptr.vmem [resolvable:$true] %s785_s17 }
  0x23   : > { %v1011_v18 = vpack.c.bf16 %v377_v17, %v376_v16  ;;  %v1015_v21 = vpack.c.bf16 %v379_v20, %v378_v19  ;;  %v380_v22 = vld [vmem:[%s1378_s8 + $0x30] sm:$0xff]  ;;  %v381_v23 = vld [vmem:[%s1378_s8 + $0x38] sm:$0xff]  ;;  %v382_v25 = vld [vmem:[%s1378_s8 + $0x40] sm:$0xff]  ;;  %s1159_s11 = scalar_lea.vmem %s1450_s17, 256  ;;  %s1258_s12 = smov [#allocation2]  }
  0x24   : > { %1008 = vmatprep.subr.bf16.mxu0 %v1007_v15  ;;  %v1019_v24 = vpack.c.bf16 %v381_v23, %v380_v22  ;;  %v383_v26 = vld [vmem:[%s1378_s8 + $0x48] sm:$0xff]  ;;  %v384_v27 = vld [vmem:[%s1378_s8 + $0x50] sm:$0xff]  ;;  %v385_v29 = vld [vmem:[%s1378_s8 + $0x58] sm:$0xff]  ;;  %p1160_p1 = scmp.ne.s32.totalorder %s1450_s17, %s1159_s11  ;;  %s1163_s16 = sshll.u32 %s1258_s12, 4  ;;  %s1164_s16 = int_to_ptr.vmem [resolvable:$false] %s1163_s16 }
  0x25   : > { %323 = vadd.xlane.f32.xlu0 %v303_v1  ;;  %1010 = vmatpush3.bf16.msra.mxu0 %v1007_v15  ;;  %v1023_v28 = vpack.c.bf16 %v383_v26, %v382_v25  ;;  %v1027_v30 = vpack.c.bf16 %v385_v29, %v384_v27  ;;  %v386_v31 = vld [vmem:[%s1378_s8 + $0x60] sm:$0xff]  ;;  %v387_v32 = vld [vmem:[%s1378_s8 + $0x68] sm:$0xff]  ;;  %v388_v34 = vld [vmem:[%s1378_s8 + $0x70] sm:$0xff]  ;;  %s1165_s18 = scalar_lea.vmem %s1164_s16, 512  ;;  %p1166_p5 = scmp.lt.s32.totalorder %s1450_s17, %s1164_s16 }
  0x26   : > { %1012 = vmatprep.subr.bf16.mxu0 %v1011_v18  ;;  %v1031_v33 = vpack.c.bf16 %v387_v32, %v386_v31  ;;  %v389_v35 = vld [vmem:[%s1378_s8 + $0x78] sm:$0xff]  ;;  %v896_v54 = vld [vmem:[%s1509_s1] ss:$0 sm:$0xff]  ;;  %s1255_s8 = smov 96   ;;  %vm1040_vm5 = vmpackc.low %vm482_vm4, %vm482_vm4  ;;  %p1161_p2 = pnand %p1160_p1, %p1345_p3 }
  0x27   : > { %v1035_v36 = vpack.c.bf16 %v389_v35, %v388_v34  ;;  %v897_v56 = vld [vmem:[%s1510_s2] ss:$0 sm:$0xff]  ;;  %v683_v35 = vld [vmem:[%s1383_s14 + $0x8] sm:$0xff]  ;;  %p1167_p6 = scmp.lt.s32.totalorder %s1165_s18, %s1159_s11 }
  0x28   : > { %v682_v34 = vld [vmem:[%s1383_s14] sm:$0xff]  ;;  %p1162_p4 = pneg %p1161_p2 }
  0x29   : > { %1014 = vmatpush3.bf16.msra.mxu0 %v1011_v18  ;;  %p1168_p7 = por %p1167_p6, %p1166_p5 }
  0x2a   : > { %1016 = vmatprep.subr.bf16.mxu0 %v1015_v21 }
  0x2b   : > { %p1169_p8 = pnand %p1168_p7, %p1162_p4 }
  0x2d   : > { %1018 = vmatpush3.bf16.msra.mxu0 %v1015_v21 }
  0x2e   : > { %1020 = vmatprep.subr.bf16.mxu0 %v1019_v24 }
  0x31   : > { %1022 = vmatpush3.bf16.msra.mxu0 %v1019_v24 }
  0x32   : > { %1024 = vmatprep.subr.bf16.mxu0 %v1023_v28 }
  0x35   : > { %1026 = vmatpush3.bf16.msra.mxu0 %v1023_v28 }
  0x36   : > { %1028 = vmatprep.subr.bf16.mxu0 %v1027_v30 }
  0x39   : > { %1030 = vmatpush3.bf16.msra.mxu0 %v1027_v30 }
  0x3a   : > { %1032 = vmatprep.subr.bf16.mxu0 %v1031_v33 }
  0x3d   : > { %1034 = vmatpush3.bf16.msra.mxu0 %v1031_v33 }
  0x3e   : > { %1036 = vmatprep.subr.bf16.mxu0 %v1035_v36 }
  0x41   : > { %1038 = vmatpush3.bf16.msra.mxu0 %v1035_v36 }
  0xae   : > { %v322_v5 = vpop.xlane.xlu0 %321 }
  0xaf   : > { %v326_v6 = vmul.f32 0.0078125, %v322_v5 }
  0xb1   : > { %v1393_v7 = vsub.f32 %v302_v0, %v326_v6 }
  0xb2   : > { %v324_v8 = vpop.xlane.xlu0 %323 }
  0xb3   : > { %v327_v9 = vmul.f32 0.0078125, %v324_v8  ;;  %v330_v10 = vmul.f32 %v1393_v7, %v1393_v7  ;;  %v467_v8 = vlaneseq }
  0xb5   : > { %v1397_v11 = vsub.f32 %v303_v1, %v327_v9  ;;  %332 = vadd.xlane.f32.xlu1 %v330_v10  ;;  %v468_v9 = vshrl.u32 %v467_v8, 7  ;;  %v471_v10 = vand.u32 127, %v467_v8 }
  0xb7   : > { %v331_v12 = vmul.f32 %v1397_v11, %v1397_v11  ;;  %vm472_vm6 = vcmp.gt.s32.totalorder %v471_v10, %v468_v9 }
  0xb9   : > { %334 = vadd.xlane.f32.xlu1 %v331_v12  ;;  %v1256_v12 = vmov 0.0  }
  0xba   : > { %v474_v13 = vsel %vm472_vm6, -1e+30, %v1256_v12 }
 0x142   : > { %v333_v37 = vpop.xlane.xlu1 %332 }
 0x143   : > { %v336_v38 = vmul.f32 0.0078125, %v333_v37 }
 0x145   : > { %v338_v39 = vadd.f32 1e-05, %v336_v38 }
 0x146   : > { %v335_v40 = vpop.xlane.xlu1 %334 }
 0x147   : > { %1143 = vrsqrt.f32 %v338_v39  ;;  %v337_v41 = vmul.f32 0.0078125, %v335_v40  ;;  %vm342_vm0 = vcmp.eq.f32.partialorder %v338_v39, inf  ;;  %v345_v45 = vand.u32 2147483648, %v338_v39 }
 0x148   : > { %vm344_vm1 = vcmp.eq.f32.partialorder %v338_v39, 0.0 }
 0x149   : > { %v339_v42 = vadd.f32 1e-05, %v337_v41  ;;  %v684_v41 = vld [vmem:[%s1383_s14 + $0x10] sm:$0xff] }
 0x14b   : > { %1145 = vrsqrt.f32 %v339_v42  ;;  %vm349_vm2 = vcmp.eq.f32.partialorder %v339_v42, inf  ;;  %v352_v50 = vand.u32 2147483648, %v339_v42  ;;  %vm351_vm3 = vcmp.eq.f32.partialorder %v339_v42, 0.0 }
 0x151   : > { %v1144_v43 = vpop.eup %1143 }
 0x152   : > { %v341_v44 = vmul.f32 %v1144_v43, %v338_v39 }
 0x154   : > { %v343_v46 = vsel %vm342_vm0, %v338_v39, %v341_v44  ;;  %v1049_v39 = vpack.c.bf16 %v683_v35, %v682_v34 }
 0x155   : > { %v1146_v47 = vpop.eup %1145  ;;  %v346_v48 = vsel %vm344_vm1, %v345_v45, %v343_v46 }
 0x156   : > { %v348_v49 = vmul.f32 %v1146_v47, %v339_v42  ;;  %1147 = vrcp.f32 %v346_v48 }
 0x158   : > { %v350_v51 = vsel %vm349_vm2, %v339_v42, %v348_v49  ;;  %v685_v42 = vld [vmem:[%s1383_s14 + $0x18] sm:$0xff]  ;;  %s914_s14 = sshll.u32 %s1241_s25, 8  ;;  %s1456_s25 = scalar_lea.sflag [#allocation3], %s1526_s30 }
 0x159   : > { %v353_v52 = vsel %vm351_vm3, %v352_v50, %v350_v51  ;;  %v1053_v46 = vpack.c.bf16 %v685_v42, %v684_v41  ;;  %v681_v49 = vld [vmem:[%s1385_s13 + $0x8] sm:$0xff]  ;;  %v680_v50 = vld [vmem:[%s1385_s13] sm:$0xff]  ;;  %s1448_s29 = scalar_lea.hbm %s1514_s6, %s914_s14 }
 0x15a   : > { %1149 = vrcp.f32 %v353_v52 }
 0x160   : > { %v1148_v53 = vpop.eup %1147 }
 0x161   : > { %v355_v55 = vmul.f32 %v1148_v53, %v1393_v7 }
 0x163   : > { %v364_v57 = vmul.f32 %v896_v54, %v355_v55 }
 0x164   : > { %v1150_v58 = vpop.eup %1149 }
 0x165   : > { %v357_v59 = vmul.f32 %v1150_v58, %v1397_v11  ;;  %v372_v60 = vadd.f32 %v897_v56, %v364_v57  ;;  %v469_v11 = vadd.s32 8, %v468_v9 }
 0x167   : > { %v365_v61 = vmul.f32 %v896_v54, %v357_v59  ;;  %979 = vmatprep.mubr.f32.mxu0 %v372_v60  ;;  %vm473_vm7 = vcmp.gt.s32.totalorder %v471_v10, %v469_v11 }
 0x168   : > { %v475_v15 = vsel %vm473_vm7, -1e+30, %v1256_v12 }
 0x169   : > { %v373_v62 = vadd.f32 %v897_v56, %v365_v61 }
 0x16b   : > { %980 = vmatmul.mubr.f32.vlgmr.msra.gmra.mrb[0].mxu0 %v373_v62 }
 0x23e   : > { %v981_v63 = vpop.f32.mrb[0].mxu0 }
 0x23f   : > { %v456_v0 = vpop.f32.mrb[1].mxu0  ;;  %v466_v7 = vmul.f32 0.17677669, %v981_v63 }
 0x240   : > { %v1138_v1 = vpack.i.bf16 %v981_v63, %v456_v0  ;;  %v465_v2 = vmul.f32 0.17677669, %v456_v0 }
 0x242   : > { %1134 = vrot.lane.b32.xlu0 %v1138_v1, %s1255_s8  ;;  %986 = vmatprep.mubr.msk.f32.mxu1 %vm482_vm4, %v465_v2 }
 0x2b4   : > { %v1135_v3 = vpop.permute.xlu0 %1134 }
 0x2b5   : > { %v1137_v4 = vunpack.i.h.bf16 %v1135_v3  ;;  %v1136_v5 = vunpack.i.l.bf16 %v1135_v3 }
 0x2b7   : > { %v1039_v6 = vpack.c.bf16 %v1137_v4, %v1136_v5 }
 0x2b9   : > { %1041 = vmatprep.subr.msk.bf16.mxu1 %vm1040_vm5, %v1039_v6 }
 0x2ba   : > { %1044 = vmatpush3.bf16.xpose.msk.msra.mxu1 %vm1040_vm5, %v1039_v6 }
 0x2c1   : > { %987 = vmatmul.mubr.msk.f32.vlgmr.msra.gmra.mrb[0].mxu1 %vm482_vm4, %v466_v7 }
 0x394   : > { %v988_v14 = vpop.f32.mrb[0].mxu1 }
 0x395   : > { %v559_v16 = vpop.f32.mrb[1].mxu1  ;;  %v565_v18 = vadd.f32 %v988_v14, %v475_v15 }
 0x396   : > { %v560_v17 = vadd.f32 %v559_v16, %v474_v13 }
 0x397   : > { %v572_v20 = vsel %vm568_vm8, %v565_v18, -inf }
 0x398   : > { %v569_v19 = vsel %vm568_vm8, %v560_v17, -inf }
 0x399   : > { %570 = vmax.xlane.f32.xlu1 %v569_v19 }
 0x39d   : > { %573 = vmax.xlane.f32.xlu1 %v572_v20 }
 0x426   : > { %v571_v21 = vpop.xlane.xlu1 %570 }
 0x427   : > { %v575_v22 = vsub.f32 %v560_v17, %v571_v21 }
 0x429   : > { %v577_v25 = vmul.f32 1.442695, %v575_v22 }
 0x42a   : > { %v574_v23 = vpop.xlane.xlu1 %573 }
 0x42b   : > { %v576_v24 = vsub.f32 %v565_v18, %v574_v23 }
 0x42d   : > { %v579_v26 = vmul.f32 1.442695, %v576_v24 }
 0x42f   : > { %1151 = vpow2.f32 %v579_v26 }
 0x430   : > { %1153 = vpow2.f32 %v577_v25 }
 0x439   : > { %v1152_v27 = vpop.eup %1151 }
 0x43a   : > { %v584_v28 = vsel %vm568_vm8, %v1152_v27, 0.0  ;;  %v1154_v29 = vpop.eup %1153 }
 0x43b   : > { %585 = vadd.xlane.f32.xlu1 %v584_v28  ;;  %v581_v30 = vsel %vm568_vm8, %v1154_v29, 0.0 }
 0x43f   : > { %582 = vadd.xlane.f32.xlu1 %v581_v30 }
 0x450   : > { %1139 = vrot.lane.b32.xlu1 %v1138_v1, %s1257_s15 }
 0x4c8   : > { %v586_v31 = vpop.xlane.xlu1 %585 }
 0x4c9   : > { %1155 = vrcp.f32 %v586_v31 }
 0x4cc   : > { %v583_v32 = vpop.xlane.xlu1 %582 }
 0x4cd   : > { %1157 = vrcp.f32 %v583_v32 }
 0x4d0   : > { %v1140_v33 = vpop.permute.xlu1 %1139 }
 0x4d1   : > { %v1142_v36 = vunpack.i.h.bf16 %v1140_v33  ;;  %v1141_v37 = vunpack.i.l.bf16 %v1140_v33 }
 0x4d3   : > { %v1045_v38 = vpack.c.bf16 %v1142_v36, %v1141_v37  ;;  %v1156_v40 = vpop.eup %1155 }
 0x4d4   : > { %v592_v45 = vmul.f32 %v1156_v40, %v1152_v27 }
 0x4d5   : > { %1046 = vmatprep.subr.bf16.mxu1 %v1045_v38 }
 0x4d6   : > { %1048 = vmatpush3.bf16.msra.mxu1 %v1045_v38 }
 0x4d7   : > { %v1158_v43 = vpop.eup %1157  ;;  %1050 = vmatprep.subr.bf16.mxu1 %v1049_v39 }
 0x4d8   : > { %v591_v44 = vmul.f32 %v1158_v43, %v1154_v29 }
 0x4da   : > { %993 = vmatprep.mubr.msk.f32.mxu1 %vm568_vm8, %v591_v44 }
 0x4db   : > { %994 = vmatmul.mubr.msk.f32.vlgmr.msra.gmra.mrb[2].mxu1 %vm568_vm8, %v592_v45 }
 0x4dc   : > { %1052 = vmatpush3.bf16.msra.mxu1 %v1049_v39 }
 0x4dd   : > { %1054 = vmatprep.subr.bf16.mxu1 %v1053_v46 }
 0x4e0   : > { %1056 = vmatpush3.bf16.msra.mxu1 %v1053_v46 }
 0x5ae   : > { %v995_v47 = vpop.f32.mrb[2].mxu1 }
 0x5af   : > { %v671_v48 = vpop.f32.mrb[3].mxu1 }
 0x5b0   : > { %1004 = vmatprep.mubr.msk.f32.mxu1 %vm482_vm4, %v671_v48 }
 0x5b1   : > { %1005 = vmatmul.mubr.msk.f32.vlgmr.msra.gmra.mrb[4].mxu1 %vm482_vm4, %v995_v47 }
 0x684   : > { %v1006_v51 = vpop.f32.mrb[4].mxu1 }
 0x685   : > { %v768_v52 = vadd.f32 %v1006_v51, %v681_v49  ;;  %v758_v53 = vpop.f32.mrb[5].mxu1 }
 0x686   : > { %v767_v54 = vadd.f32 %v758_v53, %v680_v50 }
 0x687   : > { %770 = vst [vmem:[%s1385_s13 + $0x8] sm:$0xff] %v768_v52 }
 0x688   : > { %769 = vst [vmem:[%s1385_s13] sm:$0xff] %v767_v54 }
 0x689   : > { %1172 = shalt.err (!%p1169_p8)
}
 0x68a   : > { %s1173_s13 = scalar_lea.hbm %s1448_s29, 256  ;;  %s1177_s27 = scalar_lea.hbm %s1514_s6, 512 }
 0x68b   : > { %p1174_p10 = scmp.ne.s32.totalorder %s1448_s29, %s1173_s13  ;;  %p1178_p13 = scmp.lt.u32.totalorder %s1448_s29, %s1514_s6 }
 0x68c   : > { %p1179_p0 = scmp.lt.u32.totalorder %s1177_s27, %s1173_s13  ;;  %p1181_p2 = scmp.lt.u32.totalorder %s1173_s13, %s1448_s29 }
 0x68d   : > { %p1175_p11 = pnand %p1174_p10, %p1345_p3 }
 0x68e   : > { %p1180_p1 = por %p1179_p0, %p1178_p13 }
 0x68f   : > { %p1176_p12 = pneg %p1175_p11 }
 0x690   : > { %p1182_p4 = por %p1181_p2, %p1180_p1 }
 0x692   : > { %p1183_p5 = pnand %p1182_p4, %p1176_p12 }
 0x694   : > { %1186 = shalt.err (!%p1183_p5)
}
 0x695   : > { %s1259_s15 = smov 128   ;;  %s1260_s14 = smov 8  }
 0x696   : > { %1057 = dma.vmem_to_hbm [thread:$0]  (%p1345_p3), %s1450_s17, 256, %s1448_s29, %s1456_s25, %s1259_s15, %s1259_s15, %s1260_s14  }
 0x697 PF: > { %p1063_p6 = scmp.ge.s32.totalorder %s1253_s28, 2  ;;  %s800_s19 = sand.u32 1, %s1225_s21  }
 0x698   : > { %s801_s20 = scalar_lea.sflag [#allocation3], %s800_s19 }
 0x699   : > { %p1060_p7 = pnand %p1063_p6, %p1355_p9 }
 0x69b   : > { %1220 = dma.done.wait (!%p1060_p7), %s801_s20, 256  }
 0x69c   : > { %1222 = vsyncadd (!%p1060_p7), %s801_s20, 4294967040  ;;  %s19_s28 = sadd.s32 1, %s1253_s28   ;;  %s1527_s30 = sld [smem:[#allocation9_spill]] }
 0x69d   : > { %p16_p8 = scmp.ge.s32.totalorder %s19_s28, 10   ;;  %s1528_s24 = sld [smem:[#allocation5_spill]] }
 0x69e   : > { %s1529_s25 = sld [smem:[#allocation6_spill]]  ;;  %s1530_s26 = sld [smem:[#allocation7_spill]] }
 0x69f   : > { %s1531_s27 = sld [smem:[#allocation8_spill]]  ;;  %s1532_s21 = smov %s1229_s22 }
 0x6a0   : > { %s1533_s22 = smov %s1233_s23  ;;  %18 = sbr.rel (!%p16_p8) target bundleno = 5 (0x5), region = 89 }
 0x6a2   : > { %s1534_s23 = smov %s1527_s30 }
 0x6a7   :  { %806 = vsyncpa [#allocation3], 1 }
 0x6a8   :  { %808 = vsyncpa [#allocation3 + $0x1], 1 }

</bundles_post_ra>
